<compile_context>
chip_gen: v7x
topology: tpu7x:2x2x1
jax: 0.10.0
libtpu: 0.0.40
codegen_flags: <defaults>
</compile_context>

<pallas_src>
import jax
import jax.numpy as jnp
from jax.experimental import pallas as pl
from jax.experimental.pallas import tpu as pltpu


# --------------------------------------------------------------------------
# Kernel
# --------------------------------------------------------------------------
def _fused_lego_kernel(x_ref,
                       w1_ref, b1_ref,
                       w2_ref, b2_ref,
                       w3_ref, b3_ref,
                       w4_ref, b4_ref,
                       out_ref):
    """Fused actor+critic MLP: 4 x (matmul -> bias -> ReLU) on packed weights."""
    h = x_ref[...]                                             # (B, F) f32
    for w_ref, b_ref in ((w1_ref, b1_ref), (w2_ref, b2_ref),
                         (w3_ref, b3_ref), (w4_ref, b4_ref)):
        # bf16 operands into the MXU, f32 accumulate; bias/ReLU in f32 on VPU.
        h = jnp.dot(h.astype(jnp.bfloat16), w_ref[...],
                    preferred_element_type=jnp.float32)
        h = jnp.maximum(h + b_ref[...], 0.0)
    out_ref[...] = h.astype(out_ref.dtype)


# --------------------------------------------------------------------------
# Wrapper
# --------------------------------------------------------------------------
def lego_fused_forward(x, packed_params, *, batch_tile=512):
    """Run the fused kernel. Returns the concatenated (B, pi+vf) latent slab."""
    (w1, b1), (w2, b2), (w3, b3), (w4, b4) = packed_params
    B, F = x.shape
    out_dim = w4.shape[1]

    # Pad the batch: at least one full sublane (8); a whole tile when tiling.
    if B > batch_tile:
        Bp = pl.cdiv(B, batch_tile) * batch_tile
    else:
        Bp = max(8, pl.cdiv(B, 8) * 8)
    x_in = jnp.pad(x, ((0, Bp - B), (0, 0))) if Bp != B else x

    args = (x_in, w1, b1, w2, b2, w3, b3, w4, b4)
    flops = 2 * Bp * (w1.shape[0] * w1.shape[1] + w2.shape[0] * w2.shape[1]
                      + w3.shape[0] * w3.shape[1] + w4.shape[0] * w4.shape[1])
    bytes_accessed = (sum(int(a.size) * a.dtype.itemsize for a in args)
                      + Bp * out_dim * 4)
    cost = pl.CostEstimate(flops=int(flops), transcendentals=0,
                           bytes_accessed=int(bytes_accessed))

    if Bp > batch_tile:
        # Large batch: tile rows; weights whole-array + constant index_map
        # (stay resident across grid steps); shard rows across TCs (v7x).
        def whole(shape):
            return pl.BlockSpec(shape, lambda i: (0, 0))

        in_specs = ([pl.BlockSpec((batch_tile, F), lambda i: (i, 0))]
                    + [whole(a.shape) for a in args[1:]])
        out_specs = pl.BlockSpec((batch_tile, out_dim), lambda i: (i, 0))
        call = pl.pallas_call(
            _fused_lego_kernel,
            out_shape=jax.ShapeDtypeStruct((Bp, out_dim), jnp.float32),
            grid=(Bp // batch_tile,),
            in_specs=in_specs,
            out_specs=out_specs,
            compiler_params=pltpu.CompilerParams(
                dimension_semantics=("parallel",)),
            cost_estimate=cost,
        )
    else:
        # Small batch: single gridless invocation, everything VMEM-resident.
        vmem = pl.BlockSpec(memory_space=pltpu.MemorySpace.VMEM)
        call = pl.pallas_call(
            _fused_lego_kernel,
            out_shape=jax.ShapeDtypeStruct((Bp, out_dim), jnp.float32),
            in_specs=[vmem] * len(args),
            out_specs=vmem,
            cost_estimate=cost,
        )
    out = call(*args)
    return out[:B] if Bp != B else out


# --------------------------------------------------------------------------
# Parameter init / packing
# --------------------------------------------------------------------------
def init_mlp_params(key, dims):
    """nn.Linear-style init: uniform(-1/sqrt(in), 1/sqrt(in)); W is (in, out)."""
    params = []
    for in_d, out_d in zip(dims[:-1], dims[1:]):
        key, kw, kb = jax.random.split(key, 3)
        bound = 1.0 / jnp.sqrt(jnp.float32(in_d))
        W = jax.random.uniform(kw, (in_d, out_d), jnp.float32, -bound, bound)
        b = jax.random.uniform(kb, (1, out_d), jnp.float32, -bound, bound)
        params.append((W, b))
    return params, key


def _block_diag(a, b):
    z_tr = jnp.zeros((a.shape[0], b.shape[1]), a.dtype)
    z_bl = jnp.zeros((b.shape[0], a.shape[1]), a.dtype)
    top = jnp.concatenate([a, z_tr], axis=1)
    bot = jnp.concatenate([z_bl, b], axis=1)
    return jnp.concatenate([top, bot], axis=0)


def pack_two_head_params(pi_params, vf_params, mxu_dtype=jnp.bfloat16):
    """Pack the two heads: layer 1 concatenated on out-axis, layers 2-4 block-diag."""
    packed = []
    for layer, ((wp, bp), (wv, bv)) in enumerate(zip(pi_params, vf_params)):
        if layer == 0:
            w = jnp.concatenate([wp, wv], axis=1)   # shared input x
        else:
            w = _block_diag(wp, wv)                 # keeps [pi || vf] separated
        b = jnp.concatenate([bp, bv], axis=1)
        packed.append((w.astype(mxu_dtype), b.astype(jnp.float32)))
    return packed


# --------------------------------------------------------------------------
# Module
# --------------------------------------------------------------------------
class LegoNetworkPallas:
    """JAX/Pallas re-implementation of LegoNetwork (policy + value MLPs)."""

    def __init__(self, feature_dim, last_layer_dim_pi=64, last_layer_dim_vf=64,
                 key=None):
        self.latent_dim_pi = last_layer_dim_pi
        self.latent_dim_vf = last_layer_dim_vf
        self.hidden_dim1 = feature_dim * 2
        self.hidden_dim2 = last_layer_dim_pi * 2
        if key is None:
            key = jax.random.PRNGKey(0)
        pi_dims = [feature_dim, self.hidden_dim1, self.hidden_dim1,
                   self.hidden_dim2, last_layer_dim_pi]
        vf_dims = [feature_dim, self.hidden_dim1, self.hidden_dim1,
                   self.hidden_dim2, last_layer_dim_vf]
        self.pi_params, key = init_mlp_params(key, pi_dims)
        self.vf_params, key = init_mlp_params(key, vf_dims)
        self.packed_params = pack_two_head_params(self.pi_params, self.vf_params)

    def forward(self, features):
        out = lego_fused_forward(features, self.packed_params)
        return out[:, :self.latent_dim_pi], out[:, self.latent_dim_pi:]

    def forward_actor(self, features):
        return self.forward(features)[0]

    def forward_critic(self, features):
        return self.forward(features)[1]


# --------------------------------------------------------------------------
# References (pure JAX) for correctness checks
# --------------------------------------------------------------------------
def _reference_mlp_f32(x, params):
    h = x
    for W, b in params:
        h = jnp.maximum(h @ W + b, 0.0)
    return h


def _reference_packed_bf16(x, packed):
    h = x
    for W, b in packed:
        h = jnp.dot(h.astype(jnp.bfloat16), W, preferred_element_type=jnp.float32)
        h = jnp.maximum(h + b, 0.0)
    return h


if __name__ == "__main__":
    key = jax.random.PRNGKey(0)
    key, kx = jax.random.split(key)

    batch = 8
    feature_dim = 32
    last_layer_dim_pi = 64
    last_layer_dim_vf = 64

    features = jax.random.normal(kx, (batch, feature_dim), jnp.float32)
    net = LegoNetworkPallas(feature_dim, last_layer_dim_pi, last_layer_dim_vf,
                            key=key)

    latent_pi, latent_vf = net.forward(features)
    latent_pi = jax.block_until_ready(latent_pi)
    latent_vf = jax.block_until_ready(latent_vf)

    assert latent_pi.shape == (batch, last_layer_dim_pi)
    assert latent_vf.shape == (batch, last_layer_dim_vf)

    # Exact-math reference (same bf16-operand / f32-accumulate recipe).
    fused_ref = _reference_packed_bf16(features, net.packed_params)
    fused_out = jnp.concatenate([latent_pi, latent_vf], axis=1)
    assert jnp.allclose(fused_out, fused_ref, atol=1e-3, rtol=1e-3)

    # Full-precision per-head reference (loose tolerance due to bf16 MXU operands).
    ref_pi = _reference_mlp_f32(features, net.pi_params)
    ref_vf = _reference_mlp_f32(features, net.vf_params)
    assert jnp.allclose(latent_pi, ref_pi, atol=5e-2, rtol=5e-2)
    assert jnp.allclose(latent_vf, ref_vf, atol=5e-2, rtol=5e-2)

    # Also exercise an odd (non-sublane-multiple) batch to check the pad path.
    feats_odd = jax.random.normal(kx, (5, feature_dim), jnp.float32)
    pi_odd, vf_odd = net.forward(feats_odd)
    pi_odd = jax.block_until_ready(pi_odd)
    assert pi_odd.shape == (5, last_layer_dim_pi)
    assert vf_odd.shape == (5, last_layer_dim_vf)
    assert jnp.allclose(pi_odd, _reference_mlp_f32(feats_odd, net.pi_params),
                        atol=5e-2, rtol=5e-2)

    print("KERNEL_OK")
</pallas_src>

<mosaic_0001>
module attributes {stable_mosaic.version = 11 : i64} {
  func.func @_fused_lego_kernel(%arg0: memref<8x32xf32, #tpu.memory_space<vmem>>, %arg1: memref<32x128xbf16, #tpu.memory_space<vmem>>, %arg2: memref<1x128xf32, #tpu.memory_space<vmem>>, %arg3: memref<128x128xbf16, #tpu.memory_space<vmem>>, %arg4: memref<1x128xf32, #tpu.memory_space<vmem>>, %arg5: memref<128x256xbf16, #tpu.memory_space<vmem>>, %arg6: memref<1x256xf32, #tpu.memory_space<vmem>>, %arg7: memref<256x128xbf16, #tpu.memory_space<vmem>>, %arg8: memref<1x128xf32, #tpu.memory_space<vmem>>, %arg9: memref<8x128xf32, #tpu.memory_space<vmem>>) attributes {dimension_semantics = [], scalar_prefetch = 0 : i64, scratch_operands = 0 : i64, tpu.core_type = #tpu.core_type<tc>} {
    %c0 = arith.constant 0 : index
    %c0_0 = arith.constant 0 : index
    %0 = vector.load %arg0[%c0, %c0_0] : memref<8x32xf32, #tpu.memory_space<vmem>>, vector<8x32xf32>
    %1 = arith.truncf %0 : vector<8x32xf32> to vector<8x32xbf16>
    %c0_1 = arith.constant 0 : index
    %c0_2 = arith.constant 0 : index
    %2 = vector.load %arg1[%c0_1, %c0_2] : memref<32x128xbf16, #tpu.memory_space<vmem>>, vector<32x128xbf16>
    %cst = arith.constant dense<0.000000e+00> : vector<8x128xf32>
    %3 = tpu.matmul %1, %2, %cst {dimension_numbers = #tpu.dot_dimension_numbers<[1], [0], [0], [1], [0, 0, 1, 1], [], []>} : vector<8x32xbf16>, vector<32x128xbf16>, vector<8x128xf32> -> vector<8x128xf32>
    %c0_3 = arith.constant 0 : index
    %c0_4 = arith.constant 0 : index
    %4 = vector.load %arg2[%c0_3, %c0_4] : memref<1x128xf32, #tpu.memory_space<vmem>>, vector<1x128xf32>
    %5 = vector.broadcast %4 : vector<1x128xf32> to vector<8x128xf32>
    %6 = arith.addf %3, %5 : vector<8x128xf32>
    %cst_5 = arith.constant 0.000000e+00 : f32
    %7 = vector.broadcast %cst_5 : f32 to vector<8x128xf32>
    %8 = arith.maximumf %6, %7 : vector<8x128xf32>
    %9 = arith.truncf %8 : vector<8x128xf32> to vector<8x128xbf16>
    %c0_6 = arith.constant 0 : index
    %c0_7 = arith.constant 0 : index
    %10 = vector.load %arg3[%c0_6, %c0_7] : memref<128x128xbf16, #tpu.memory_space<vmem>>, vector<128x128xbf16>
    %cst_8 = arith.constant dense<0.000000e+00> : vector<8x128xf32>
    %11 = tpu.matmul %9, %10, %cst_8 {dimension_numbers = #tpu.dot_dimension_numbers<[1], [0], [0], [1], [0, 0, 1, 1], [], []>} : vector<8x128xbf16>, vector<128x128xbf16>, vector<8x128xf32> -> vector<8x128xf32>
    %c0_9 = arith.constant 0 : index
    %c0_10 = arith.constant 0 : index
    %12 = vector.load %arg4[%c0_9, %c0_10] : memref<1x128xf32, #tpu.memory_space<vmem>>, vector<1x128xf32>
    %13 = vector.broadcast %12 : vector<1x128xf32> to vector<8x128xf32>
    %14 = arith.addf %11, %13 : vector<8x128xf32>
    %cst_11 = arith.constant 0.000000e+00 : f32
    %15 = vector.broadcast %cst_11 : f32 to vector<8x128xf32>
    %16 = arith.maximumf %14, %15 : vector<8x128xf32>
    %17 = arith.truncf %16 : vector<8x128xf32> to vector<8x128xbf16>
    %c0_12 = arith.constant 0 : index
    %c0_13 = arith.constant 0 : index
    %18 = vector.load %arg5[%c0_12, %c0_13] : memref<128x256xbf16, #tpu.memory_space<vmem>>, vector<128x256xbf16>
    %cst_14 = arith.constant dense<0.000000e+00> : vector<8x256xf32>
    %19 = tpu.matmul %17, %18, %cst_14 {dimension_numbers = #tpu.dot_dimension_numbers<[1], [0], [0], [1], [0, 0, 1, 1], [], []>} : vector<8x128xbf16>, vector<128x256xbf16>, vector<8x256xf32> -> vector<8x256xf32>
    %c0_15 = arith.constant 0 : index
    %c0_16 = arith.constant 0 : index
    %20 = vector.load %arg6[%c0_15, %c0_16] : memref<1x256xf32, #tpu.memory_space<vmem>>, vector<1x256xf32>
    %21 = vector.broadcast %20 : vector<1x256xf32> to vector<8x256xf32>
    %22 = arith.addf %19, %21 : vector<8x256xf32>
    %cst_17 = arith.constant 0.000000e+00 : f32
    %23 = vector.broadcast %cst_17 : f32 to vector<8x256xf32>
    %24 = arith.maximumf %22, %23 : vector<8x256xf32>
    %25 = arith.truncf %24 : vector<8x256xf32> to vector<8x256xbf16>
    %c0_18 = arith.constant 0 : index
    %c0_19 = arith.constant 0 : index
    %26 = vector.load %arg7[%c0_18, %c0_19] : memref<256x128xbf16, #tpu.memory_space<vmem>>, vector<256x128xbf16>
    %cst_20 = arith.constant dense<0.000000e+00> : vector<8x128xf32>
    %27 = tpu.matmul %25, %26, %cst_20 {dimension_numbers = #tpu.dot_dimension_numbers<[1], [0], [0], [1], [0, 0, 1, 1], [], []>} : vector<8x256xbf16>, vector<256x128xbf16>, vector<8x128xf32> -> vector<8x128xf32>
    %c0_21 = arith.constant 0 : index
    %c0_22 = arith.constant 0 : index
    %28 = vector.load %arg8[%c0_21, %c0_22] : memref<1x128xf32, #tpu.memory_space<vmem>>, vector<1x128xf32>
    %29 = vector.broadcast %28 : vector<1x128xf32> to vector<8x128xf32>
    %30 = arith.addf %27, %29 : vector<8x128xf32>
    %cst_23 = arith.constant 0.000000e+00 : f32
    %31 = vector.broadcast %cst_23 : f32 to vector<8x128xf32>
    %32 = arith.maximumf %30, %31 : vector<8x128xf32>
    %c0_24 = arith.constant 0 : index
    %c0_25 = arith.constant 0 : index
    %33 = vector.load %arg9[%c0_24, %c0_25] : memref<8x128xf32, #tpu.memory_space<vmem>>, vector<8x128xf32>
    tpu.vector_store %arg9[%c0_24, %c0_25], %32 {strides = array<i32>} : memref<8x128xf32, #tpu.memory_space<vmem>>, vector<8x128xf32>,
    return
  }
}

</mosaic_0001>

<bundles_post_ra>
// kernel: tpu_custom_call.1
= control target key start
LH: loop header
LB: loop body
LE: loop exit
PB: predicated region body
PF: predicated region fallthrough
CT: control target
= control target key end

     0   :  { %14 = vsyncpa [#allocation3], 0  ;;  %s1105_s0 = inlined_call_operand.hbm [shape: f32[8,32], index: 0, kind: input, shape index: {}]   ;;  %s1106_s1 = inlined_call_operand.hbm [shape: bf16[32,128], index: 1, kind: input, shape index: {}]   ;;  %s1107_s2 = inlined_call_operand.vmem [shape: f32[1,128], index: 2, kind: input, shape index: {}]   ;;  %s1108_s3 = inlined_call_operand.hbm [shape: bf16[128,128], index: 3, kind: input, shape index: {}]   ;;  %s1109_s4 = inlined_call_operand.vmem [shape: f32[1,128], index: 4, kind: input, shape index: {}]   ;;  %s1110_s5 = inlined_call_operand.hbm [shape: bf16[128,256], index: 5, kind: input, shape index: {}]   ;;  %s1111_s6 = inlined_call_operand.vmem [shape: f32[1,256], index: 6, kind: input, shape index: {}]   ;;  %s1112_s7 = inlined_call_operand.hbm [shape: bf16[256,128], index: 7, kind: input, shape index: {}]   ;;  %s1113_s8 = inlined_call_operand.vmem [shape: f32[1,128], index: 8, kind: input, shape index: {}]   ;;  %s1114_s9 = inlined_call_operand.hbm [shape: f32[8,128], index: 9, kind: output, shape index: {}]  }
   0x1   :  { %15 = vsyncpa [#allocation6], 0 }
   0x2   :  { %16 = vsyncpa [#allocation9], 0 }
   0x3   :  { %17 = vsyncpa [#allocation4], 0  ;;  %s942_s30 = smov [#allocation5]   ;;  %s802_s13 = scalar_lea.hbm %s1106_s1, 256 }
   0x4   :  { %s33_s10 = sshll.u32 %s942_s30, 4  ;;  %p803_p0 = scmp.ne.s32.totalorder %s1106_s1, %s802_s13  ;;  %s34_s10 = int_to_ptr.vmem [resolvable:$true] %s33_s10 }
   0x5   :  { %p806_p1 = scmp.lt.u32.totalorder %s802_s13, %s1106_s1 }
   0x7   :  { %p808_p2 = pnand %p806_p1, %p803_p0 }
   0x9   :  { %811 = shalt.err (!%p808_p2)
}
   0xa   :  { %s812_s18 = scalar_lea.vmem %s34_s10, 256  ;;  %p817_p4 = scmp.lt.s32.totalorder %s34_s10, %s34_s10 }
   0xb   :  { %p813_p3 = scmp.ne.s32.totalorder %s34_s10, %s812_s18  ;;  %p818_p5 = scmp.lt.s32.totalorder %s812_s18, %s812_s18 }
   0xd   :  { %p819_p6 = por %p818_p5, %p817_p4 }
   0xf   :  { %p820_p7 = pnand %p819_p6, %p813_p3 }
  0x11   :  { %823 = shalt.err (!%p820_p7)
}
  0x12   :  { %s943_s19 = smov 64   ;;  %s944_s20 = smov 4  }
  0x13   :  { %39 = dma.hbm_to_vmem [thread:$0]  %s1106_s1, 256, %s34_s10, [#allocation6], %s943_s19, %s943_s19, %s944_s20  }
  0x14   :  { %s945_s23 = smov [#allocation8]   ;;  %s824_s27 = scalar_lea.hbm %s1110_s5, 2048 }
  0x15   :  { %s61_s24 = sshll.u32 %s945_s23, 4  ;;  %p825_p8 = scmp.ne.s32.totalorder %s1110_s5, %s824_s27  ;;  %s62_s24 = int_to_ptr.vmem [resolvable:$true] %s61_s24 }
  0x16   :  { %p828_p9 = scmp.lt.u32.totalorder %s824_s27, %s1110_s5 }
  0x18   :  { %p830_p10 = pnand %p828_p9, %p825_p8 }
  0x1a   :  { %833 = shalt.err (!%p830_p10)
}
  0x1b   :  { %s834_s12 = scalar_lea.vmem %s62_s24, 2048  ;;  %p839_p12 = scmp.lt.s32.totalorder %s62_s24, %s62_s24 }
  0x1c   :  { %p835_p11 = scmp.ne.s32.totalorder %s62_s24, %s834_s12  ;;  %p840_p13 = scmp.lt.s32.totalorder %s834_s12, %s834_s12 }
  0x1e   :  { %p841_p0 = por %p840_p13, %p839_p12 }
  0x20   :  { %p842_p1 = pnand %p841_p0, %p835_p11 }
  0x22   :  { %845 = shalt.err (!%p842_p1)
}
  0x23   :  { %s946_s1 = smov 128   ;;  %s947_s10 = smov 8  }
  0x24   :  { %67 = dma.hbm_to_vmem [thread:$0]  %s1110_s5, 2048, %s62_s24, [#allocation9], %s946_s1, %s946_s1, %s947_s10  }
  0x25   :  { %s948_s15 = smov [#allocation2]   ;;  %s949_s17 = smov [#allocation7]  }
  0x26   :  { %s24_s16 = sshll.u32 %s948_s15, 4  ;;  %s47_s18 = sshll.u32 %s949_s17, 4  ;;  %s25_s16 = int_to_ptr.vmem [resolvable:$true] %s24_s16  ;;  %s1032_s18 = int_to_ptr.vmem [resolvable:$true] %s47_s18 }
  0x27   :  { %s846_s23 = scalar_lea.hbm %s1105_s0, 128 }
  0x28   :  { %p847_p2 = scmp.ne.s32.totalorder %s1105_s0, %s846_s23  ;;  %p850_p3 = scmp.lt.u32.totalorder %s846_s23, %s1105_s0 }
  0x2a   :  { %p852_p4 = pnand %p850_p3, %p847_p2 }
  0x2c   :  { %855 = shalt.err (!%p852_p4)
}
  0x2d   :  { %s856_s5 = scalar_lea.vmem %s25_s16, 128  ;;  %p861_p6 = scmp.lt.s32.totalorder %s25_s16, %s25_s16 }
  0x2e   :  { %p857_p5 = scmp.ne.s32.totalorder %s25_s16, %s856_s5  ;;  %p862_p7 = scmp.lt.s32.totalorder %s856_s5, %s856_s5 }
  0x30   :  { %p863_p8 = por %p862_p7, %p861_p6 }
  0x32   :  { %p864_p9 = pnand %p863_p8, %p857_p5 }
  0x34   :  { %867 = shalt.err (!%p864_p9)
}
  0x35   :  { %27 = dma.hbm_to_vmem [thread:$0]  %s1105_s0, 128, %s25_s16, [#allocation3]  }
  0x36   :  { %s868_s12 = scalar_lea.hbm %s1108_s3, 1024 }
  0x37   :  { %p869_p10 = scmp.ne.s32.totalorder %s1108_s3, %s868_s12  ;;  %p872_p11 = scmp.lt.u32.totalorder %s868_s12, %s1108_s3 }
  0x39   :  { %p874_p12 = pnand %p872_p11, %p869_p10 }
  0x3b   :  { %877 = shalt.err (!%p874_p12)
}
  0x3c   :  { %s878_s15 = scalar_lea.vmem %s1032_s18, 1024  ;;  %p883_p0 = scmp.lt.s32.totalorder %s1032_s18, %s1032_s18 }
  0x3d   :  { %p879_p13 = scmp.ne.s32.totalorder %s1032_s18, %s878_s15  ;;  %p884_p1 = scmp.lt.s32.totalorder %s878_s15, %s878_s15 }
  0x3f   :  { %p885_p2 = por %p884_p1, %p883_p0 }
  0x41   :  { %p886_p3 = pnand %p885_p2, %p879_p13 }
  0x43   :  { %889 = shalt.err (!%p886_p3)
}
  0x44   :  { %53 = dma.hbm_to_vmem [thread:$0]  %s1108_s3, 1024, %s1032_s18, [#allocation6], %s943_s19, %s943_s19, %s944_s20  }
  0x45   :  { %s950_s17 = smov [#allocation10]   ;;  %s890_s25 = scalar_lea.hbm %s1112_s7, 2048 }
  0x46   :  { %s75_s21 = sshll.u32 %s950_s17, 4  ;;  %p891_p4 = scmp.ne.s32.totalorder %s1112_s7, %s890_s25  ;;  %s76_s21 = int_to_ptr.vmem [resolvable:$true] %s75_s21 }
  0x47   :  { %p894_p5 = scmp.lt.u32.totalorder %s890_s25, %s1112_s7 }
  0x49   :  { %p896_p6 = pnand %p894_p5, %p891_p4 }
  0x4b   :  { %899 = shalt.err (!%p896_p6)
}
  0x4c   :  { %s900_s24 = scalar_lea.vmem %s76_s21, 2048  ;;  %p905_p8 = scmp.lt.s32.totalorder %s76_s21, %s76_s21 }
  0x4d   :  { %p901_p7 = scmp.ne.s32.totalorder %s76_s21, %s900_s24  ;;  %p906_p9 = scmp.lt.s32.totalorder %s900_s24, %s900_s24 }
  0x4f   :  { %p907_p10 = por %p906_p9, %p905_p8 }
  0x51   :  { %p908_p11 = pnand %p907_p10, %p901_p7 }
  0x53   :  { %911 = shalt.err (!%p908_p11)
}
  0x54   :  { %81 = dma.hbm_to_vmem [thread:$0]  %s1112_s7, 2048, %s76_s21, [#allocation9], %s943_s19, %s943_s19, %s944_s20  }
  0x55   :  { %934 = dma.done.wait [#allocation3], 128  }
  0x56   :  { %935 = vsyncadd [#allocation3], 4294967168 }
  0x57   :  { %936 = dma.done.wait [#allocation6], 1280  }
  0x58   :  { %937 = vsyncadd [#allocation6], 4294966016 }
  0x59   :  { %938 = dma.done.wait [#allocation9], 4096  }
  0x5a   :  { %939 = vsyncadd [#allocation9], 4294963200  ;;  %v951_v0 = vmov 0.0   ;;  %vm952_vm0 = vmmov 0   ;;  %v752_v1 = vld [vmem:[#allocation5] sm:$0xff]   ;;  %v753_v2 = vld [vmem:[#allocation5 + $0x8] sm:$0xff]   ;;  %v302_v62 = vlaneseq }
  0x5b   :  { %711 = vmatprep.subr.bf16.mxu0 %v951_v0  ;;  %715 = vmatprep.mubr.msk.bf16.mxu0 %vm952_vm0, %v951_v0  ;;  %v100_v3 = vld [vmem:[#allocation2] sm:$0xff]  ;;  %v754_v4 = vld [vmem:[#allocation7] sm:$0xff]   ;;  %vm125_vm1 = vcmask 261120   ;;  %v756_v7 = vld [vmem:[#allocation7 + $0x10] sm:$0xff]   ;;  %v953_v37 = vmov 0  }
  0x5c   :  { %719 = vmatprep.subr.bf16.mxu1 %v951_v0  ;;  %735 = vmatprep.mubr.msk.bf16.mxu1 %vm952_vm0, %v951_v0  ;;  %v101_v5 = vpack.c.bf16 %v100_v3, %v100_v3  ;;  %v755_v6 = vld [vmem:[#allocation7 + $0x8] sm:$0xff]   ;;  %v757_v8 = vld [vmem:[#allocation7 + $0x18] sm:$0xff]   ;;  %v758_v9 = vld [vmem:[#allocation7 + $0x20] sm:$0xff]   ;;  %v303_v63 = vshrl.u32 %v302_v62, 7 }
  0x5d   :  { %712 = vmatpush3.bf16.msra.mxu0 %v752_v1  ;;  %720 = vmatpush3.bf16.msra.mxu1 %v754_v4  ;;  %v759_v10 = vld [vmem:[#allocation7 + $0x28] sm:$0xff]   ;;  %v760_v11 = vld [vmem:[#allocation7 + $0x30] sm:$0xff]   ;;  %v761_v12 = vld [vmem:[#allocation7 + $0x38] sm:$0xff]  }
  0x5e   :  { %713 = vmatprep.subr.bf16.mxu0 %v951_v0  ;;  %721 = vmatprep.subr.bf16.mxu1 %v951_v0  ;;  %v762_v13 = vld [vmem:[#allocation8] ss:$8 sps:$4 sm:$0xff]   ;;  %v764_v14 = vld [vmem:[#allocation8 + $0x4] ss:$8 sps:$4 sm:$0xff]   ;;  %v767_v15 = vld [vmem:[#allocation8 + $0x14] ss:$8 sps:$4 sm:$0xff]  }
  0x5f   :  { %v765_v16 = vld [vmem:[#allocation8 + $0x10] ss:$8 sps:$4 sm:$0xff]   ;;  %v770_v17 = vld [vmem:[#allocation8 + $0x24] ss:$8 sps:$4 sm:$0xff]   ;;  %v768_v18 = vld [vmem:[#allocation8 + $0x20] ss:$8 sps:$4 sm:$0xff]  }
  0x60   :  { %v773_v19 = vld [vmem:[#allocation8 + $0x34] ss:$8 sps:$4 sm:$0xff]   ;;  %v771_v20 = vld [vmem:[#allocation8 + $0x30] ss:$8 sps:$4 sm:$0xff]   ;;  %v776_v21 = vld [vmem:[#allocation8 + $0x44] ss:$8 sps:$4 sm:$0xff]  }
  0x61   :  { %714 = vmatpush3.bf16.msra.mxu0 %v753_v2  ;;  %722 = vmatpush3.bf16.msra.mxu1 %v755_v6  ;;  %v774_v22 = vld [vmem:[#allocation8 + $0x40] ss:$8 sps:$4 sm:$0xff]   ;;  %v779_v23 = vld [vmem:[#allocation8 + $0x54] ss:$8 sps:$4 sm:$0xff]   ;;  %v777_v24 = vld [vmem:[#allocation8 + $0x50] ss:$8 sps:$4 sm:$0xff]  }
  0x62   :  { %723 = vmatprep.subr.bf16.mxu1 %v951_v0  ;;  %392 = vmatprep.subr.bf16.mxu0 %v764_v14  ;;  %v782_v25 = vld [vmem:[#allocation8 + $0x64] ss:$8 sps:$4 sm:$0xff]   ;;  %v780_v26 = vld [vmem:[#allocation8 + $0x60] ss:$8 sps:$4 sm:$0xff]   ;;  %v785_v35 = vld [vmem:[#allocation8 + $0x74] ss:$8 sps:$4 sm:$0xff]  }
  0x63   :  { %v631_v27 = vld [vmem:[%s1107_s2] ss:$0 sm:$0xff]  ;;  %v783_v36 = vld [vmem:[#allocation8 + $0x70] ss:$8 sps:$4 sm:$0xff]   ;;  %v786_v38 = vld [vmem:[#allocation10 + $0x40] sm:$0xff]   ;;  %v308_v2 = vsub.s32 1, %v303_v63 }
  0x64   :  { %716 = vmatmul.mubr.msk.bf16.vlgmr.msra.gmra.mrb[0].mxu0 %vm125_vm1, %v101_v5  ;;  %v787_v39 = vld [vmem:[#allocation10] sm:$0xff]   ;;  %v788_v40 = vld [vmem:[#allocation10 + $0x48] sm:$0xff]   ;;  %v790_v42 = vld [vmem:[#allocation10 + $0x50] sm:$0xff]  }
  0x65   :  { %724 = vmatpush3.bf16.msra.mxu1 %v756_v7  ;;  %393 = vmatpush1.bf16.msra.mxu0 %v762_v13  ;;  %v789_v41 = vld [vmem:[#allocation10 + $0x8] sm:$0xff]   ;;  %v791_v43 = vld [vmem:[#allocation10 + $0x10] sm:$0xff]   ;;  %v792_v44 = vld [vmem:[#allocation10 + $0x58] sm:$0xff]  }
  0x66   :  { %725 = vmatprep.subr.bf16.mxu1 %v951_v0  ;;  %394 = vmatprep.subr.bf16.mxu0 %v767_v15  ;;  %v793_v45 = vld [vmem:[#allocation10 + $0x18] sm:$0xff]   ;;  %v794_v46 = vld [vmem:[#allocation10 + $0x60] sm:$0xff]   ;;  %v796_v48 = vld [vmem:[#allocation10 + $0x68] sm:$0xff]  }
  0x67   :  { %424 = vmatprep.mubr.bf16.mxu0 %v953_v37  ;;  %v795_v47 = vld [vmem:[#allocation10 + $0x20] sm:$0xff]   ;;  %v797_v49 = vld [vmem:[#allocation10 + $0x28] sm:$0xff]   ;;  %v798_v58 = vld [vmem:[#allocation10 + $0x70] sm:$0xff]  }
  0x68   :  { %v635_v50 = vld [vmem:[%s1109_s4] ss:$0 sm:$0xff]  ;;  %v799_v59 = vld [vmem:[#allocation10 + $0x30] sm:$0xff]   ;;  %v800_v60 = vld [vmem:[#allocation10 + $0x78] sm:$0xff]  }
  0x69   :  { %726 = vmatpush3.bf16.msra.mxu1 %v757_v8  ;;  %395 = vmatpush1.bf16.msra.mxu0 %v765_v16  ;;  %v801_v61 = vld [vmem:[#allocation10 + $0x38] sm:$0xff]   ;;  %v300_v1 = vld [vmem:[%s1111_s6] sm:$0x3]  ;;  %s954_s6 = smov [#allocation11]  }
  0x6a   :  { %727 = vmatprep.subr.bf16.mxu1 %v951_v0  ;;  %396 = vmatprep.subr.bf16.mxu0 %v770_v17  ;;  %v309_v4 = vrot.slane %v300_v1, %v308_v2  ;;  %v660_v16 = vld [vmem:[%s1113_s8] ss:$0 sm:$0xff]  ;;  %s620_s12 = sshll.u32 %s954_s6, 4  ;;  %s621_s12 = int_to_ptr.vmem [resolvable:$true] %s620_s12 }
  0x6b   :  { %s912_s1 = scalar_lea.vmem %s621_s12, 128  ;;  %p917_p13 = scmp.lt.s32.totalorder %s621_s12, %s621_s12 }
  0x6c   :  { %p913_p12 = scmp.ne.s32.totalorder %s621_s12, %s912_s1  ;;  %p918_p0 = scmp.lt.s32.totalorder %s912_s1, %s912_s1 }
  0x6d   :  { %728 = vmatpush3.bf16.msra.mxu1 %v758_v9  ;;  %397 = vmatpush1.bf16.msra.mxu0 %v768_v18 }
  0x6e   :  { %729 = vmatprep.subr.bf16.mxu1 %v951_v0  ;;  %398 = vmatprep.subr.bf16.mxu0 %v773_v19  ;;  %p919_p1 = por %p918_p0, %p917_p13 }
  0x70   :  { %p920_p2 = pnand %p919_p1, %p913_p12 }
  0x71   :  { %730 = vmatpush3.bf16.msra.mxu1 %v759_v10  ;;  %399 = vmatpush1.bf16.msra.mxu0 %v771_v20 }
  0x72   :  { %731 = vmatprep.subr.bf16.mxu1 %v951_v0  ;;  %400 = vmatprep.subr.bf16.mxu0 %v776_v21 }
  0x75   :  { %732 = vmatpush3.bf16.msra.mxu1 %v760_v11  ;;  %401 = vmatpush1.bf16.msra.mxu0 %v774_v22 }
  0x76   :  { %733 = vmatprep.subr.bf16.mxu1 %v951_v0  ;;  %402 = vmatprep.subr.bf16.mxu0 %v779_v23  ;;  %v304_v0 = vsub.s32 0, %v303_v63 }
  0x78   :  { %v305_v3 = vrot.slane %v300_v1, %v304_v0 }
  0x79   :  { %734 = vmatpush3.bf16.msra.mxu1 %v761_v12  ;;  %403 = vmatpush1.bf16.msra.mxu0 %v777_v24 }
  0x7a   :  { %404 = vmatprep.subr.bf16.mxu0 %v782_v25  ;;  %689 = vmatprep.subr.bf16.mxu1 %v786_v38 }
  0x7d   :  { %405 = vmatpush1.bf16.msra.mxu0 %v780_v26 }
  0x7e   :  { %406 = vmatprep.subr.bf16.mxu0 %v785_v35 }
  0x81   :  { %407 = vmatpush1.bf16.msra.mxu0 %v783_v36 }
 0x137   :  { %v163_v28 = vpop.f32.mrb[0].mxu0 }
 0x138   :  { %v164_v29 = vadd.f32 %v631_v27, %v163_v28  ;;  %v717_v30 = vpop.f32.mrb[1].mxu0 }
 0x139   :  { %v166_v31 = vpop.f32.mrb[2].mxu0 }
 0x13a   :  { %v169_v32 = vmax.f32 %v164_v29, 0.0  ;;  %v718_v33 = vpop.f32.mrb[3].mxu0 }
 0x13c   :  { %v170_v34 = vpack.c.bf16 %v169_v32, %v169_v32 }
 0x13e   :  { %736 = vmatmul.mubr.bf16.vlgmr.msra.gmra.mrb[0].mxu1 %v170_v34 }
 0x13f   :  { %690 = vmatpush3.bf16.msra.mxu1 %v787_v39 }
 0x140   :  { %691 = vmatprep.subr.bf16.mxu1 %v788_v40 }
 0x143   :  { %692 = vmatpush3.bf16.msra.mxu1 %v789_v41 }
 0x144   :  { %693 = vmatprep.subr.bf16.mxu1 %v790_v42 }
 0x147   :  { %694 = vmatpush3.bf16.msra.mxu1 %v791_v43 }
 0x148   :  { %695 = vmatprep.subr.bf16.mxu1 %v792_v44 }
 0x14b   :  { %696 = vmatpush3.bf16.msra.mxu1 %v793_v45 }
 0x14c   :  { %697 = vmatprep.subr.bf16.mxu1 %v794_v46 }
 0x14f   :  { %698 = vmatpush3.bf16.msra.mxu1 %v795_v47 }
 0x150   :  { %699 = vmatprep.subr.bf16.mxu1 %v796_v48 }
 0x153   :  { %700 = vmatpush3.bf16.msra.mxu1 %v797_v49 }
 0x154   :  { %701 = vmatprep.subr.bf16.mxu1 %v798_v58 }
 0x157   :  { %702 = vmatpush3.bf16.msra.mxu1 %v799_v59 }
 0x158   :  { %703 = vmatprep.subr.bf16.mxu1 %v800_v60 }
 0x15b   :  { %704 = vmatpush3.bf16.msra.mxu1 %v801_v61 }
 0x211   :  { %v276_v51 = vpop.f32.mrb[0].mxu1 }
 0x212   :  { %v277_v52 = vadd.f32 %v635_v50, %v276_v51  ;;  %v737_v53 = vpop.f32.mrb[1].mxu1 }
 0x213   :  { %v279_v54 = vpop.f32.mrb[2].mxu1 }
 0x214   :  { %v282_v55 = vmax.f32 %v277_v52, 0.0  ;;  %v738_v56 = vpop.f32.mrb[3].mxu1 }
 0x216   :  { %v283_v57 = vpack.c.bf16 %v282_v55, %v282_v55 }
 0x218   :  { %425 = vmatmul.mubr.bf16.vlgmr.msra.gmra.mrb[4].mxu0 %v283_v57 }
 0x2eb   :  { %v426_v5 = vpop.f32.mrb[4].mxu0 }
 0x2ec   :  { %v427_v6 = vadd.f32 %v426_v5, %v305_v3  ;;  %v428_v7 = vpop.f32.mrb[5].mxu0 }
 0x2ed   :  { %v429_v8 = vadd.f32 %v428_v7, %v309_v4  ;;  %v430_v9 = vpop.f32.mrb[6].mxu0 }
 0x2ee   :  { %v433_v10 = vmax.f32 %v427_v6, 0.0  ;;  %v431_v11 = vpop.f32.mrb[7].mxu0 }
 0x2ef   :  { %v434_v12 = vmax.f32 %v429_v8, 0.0 }
 0x2f0   :  { %v435_v14 = vpack.c.bf16 %v433_v10, %v433_v10 }
 0x2f1   :  { %v436_v13 = vpack.c.bf16 %v434_v12, %v434_v12 }
 0x2f3   :  { %604 = vmatprep.mubr.bf16.mxu1 %v436_v13 }
 0x2f4   :  { %605 = vmatmul.mubr.bf16.vlgmr.msra.gmra.mrb[4].mxu1 %v435_v14 }
 0x3c7   :  { %v705_v15 = vpop.f32.mrb[4].mxu1 }
 0x3c8   :  { %v706_v17 = vpop.f32.mrb[5].mxu1 }
 0x3c9   :  { %v707_v18 = vadd.f32 %v706_v17, %v705_v15  ;;  %v708_v19 = vpop.f32.mrb[6].mxu1 }
 0x3ca   :  { %v709_v20 = vpop.f32.mrb[7].mxu1 }
 0x3cb   :  { %v607_v21 = vadd.f32 %v707_v18, %v660_v16 }
 0x3cd   :  { %v612_v22 = vmax.f32 %v607_v21, 0.0 }
 0x3cf   :  { %613 = vst [vmem:[#allocation11] sm:$0xff] %v612_v22 }
 0x3d0   :  { %923 = shalt.err (!%p920_p2)
}
 0x3d1   :  { %s924_s8 = scalar_lea.hbm %s1114_s9, 128 }
 0x3d2   :  { %p925_p3 = scmp.ne.s32.totalorder %s1114_s9, %s924_s8  ;;  %p928_p4 = scmp.lt.u32.totalorder %s924_s8, %s1114_s9 }
 0x3d4   :  { %p930_p5 = pnand %p928_p4, %p925_p3 }
 0x3d6   :  { %933 = shalt.err (!%p930_p5)
}
 0x3d7   :  { %623 = dma.vmem_to_hbm [thread:$0]  %s621_s12, 128, %s1114_s9, [#allocation4]  }
 0x3d8   :  { %940 = dma.done.wait [#allocation4], 128  }
 0x3d9   :  { %941 = vsyncadd [#allocation4], 4294967168 }
 0x3da   :  { %627 = vsyncpa [#allocation3], 1 }
 0x3db   :  { %628 = vsyncpa [#allocation6], 1 }
 0x3dc   :  { %629 = vsyncpa [#allocation9], 1 }
 0x3dd   :  { %630 = vsyncpa [#allocation4], 1 }

</bundles_post_ra>
